<compile_context>
chip_gen: v7x
topology: tpu7x:2x2x1
jax: 0.10.0
libtpu: 0.0.40
codegen_flags: <defaults>
</compile_context>

<pallas_src>
import jax
import jax.numpy as jnp
from jax import lax
from jax.experimental import pallas as pl
from jax.experimental.pallas import tpu as pltpu


_SUB = 128                 # rows per in-kernel sub-chunk (bounds vreg pressure)
_LANE_MULT = 256           # batch-tile row multiple (MXU-friendly on all gens)
_VMEM_BUDGET = 24 << 20    # budget for double-buffered blocks (fits v7x 64 MiB)


def _round_up(x, m):
    return ((x + m - 1) // m) * m


def mlp_kernel(ef_ref, wcat_ref, bcat_ref, w1_ref, b1_ref, w2_ref, b2_ref,
               out_ref):
    # Hoist the tiny, VMEM-resident parameters out of the row loop.
    wcat = wcat_ref[...]     # (2, 128)   block-diag [wE; wF]
    bcat = bcat_ref[...]     # (1, 128)   [bE | bF]
    w1 = w1_ref[...]         # (128, 64)
    b1 = b1_ref[...]         # (1, 64)
    w2 = w2_ref[...]         # (64, od_pad)
    b2 = b2_ref[...]         # (1, od_pad)

    tb = ef_ref.shape[0]
    n_sub = tb // _SUB       # tb is a multiple of 256 => n_sub >= 2, exact

    def body(s, carry):
        r = pl.multiple_of(s * _SUB, _SUB)
        ef = ef_ref[pl.ds(r, _SUB), :]                              # (SUB, 2)

        # Fused fc_E1 / fc_F1 + concat: block-diagonal (SUB,2)@(2,128) matmul.
        x_all = jnp.dot(ef, wcat, preferred_element_type=jnp.float32)
        x_all = jnp.maximum(x_all + bcat, 0.0)                      # (SUB, 128)

        # fc1: Linear(128 -> 64) + ReLU  (MXU, f32 accumulate)
        h = jnp.dot(x_all, w1, preferred_element_type=jnp.float32)
        h = jnp.maximum(h + b1, 0.0)                                # (SUB, 64)

        # fc2: Linear(64 -> od_pad), no activation (padded cols are exact 0)
        out = jnp.dot(h, w2, preferred_element_type=jnp.float32) + b2
        out_ref[pl.ds(r, _SUB), :] = out                            # lane-dense
        return carry

    unroll = True if n_sub <= 8 else 8
    lax.fori_loop(0, n_sub, body, 0, unroll=unroll)


def mlp_model2_forward(A, B, C, D, E, F, G, H, I, params, *, block_batch=4096):
    """Pallas wrapper. Only E and F are used (matching the PyTorch forward)."""
    del A, B, C, D, G, H, I  # unused by MLPModel2.forward
    batch = E.shape[0]
    out_dim = params["w2"].shape[1]
    od_pad = _round_up(out_dim, 128)          # lane-dense output block width

    # --- Parameter fusion / padding (wrapper-side, once) ---
    zeros64 = jnp.zeros((1, 64), jnp.float32)
    w_cat = jnp.concatenate(
        [jnp.concatenate([params["wE"], zeros64], axis=1),
         jnp.concatenate([zeros64, params["wF"]], axis=1)], axis=0)   # (2, 128)
    b_cat = jnp.concatenate([params["bE"], params["bF"]], axis=1)     # (1, 128)
    w2p = jnp.pad(params["w2"].astype(jnp.float32),
                  ((0, 0), (0, od_pad - out_dim)))                    # (64, od_pad)
    b2p = jnp.pad(params["b2"].astype(jnp.float32),
                  ((0, 0), (0, od_pad - out_dim)))                    # (1, od_pad)

    # EF packed as a single lane-adjacent (batch, 2) input.
    ef = jnp.concatenate([E, F], axis=1).astype(jnp.float32)

    # --- Batch-tile selection ---
    tb = min(block_batch, _round_up(batch, _LANE_MULT))
    tb = _round_up(tb, _LANE_MULT)            # full-width MXU passes / stores
    # VMEM ceiling: double-buffered, lane-padded EF (tb,128) + out (tb,od_pad)
    per_row = 2 * (128 + od_pad) * 4
    tb_cap = max(_LANE_MULT, (_VMEM_BUDGET // per_row) // _LANE_MULT * _LANE_MULT)
    tb = min(tb, tb_cap)
    padded = _round_up(batch, tb)
    # Keep >= 2 grid steps when batch allows, so v7x megacore shards the grid.
    if padded // tb < 2 and batch > _LANE_MULT:
        tb = _round_up((batch + 1) // 2, _LANE_MULT)
        padded = _round_up(batch, tb)

    if padded != batch:
        ef = jnp.pad(ef, ((0, padded - batch), (0, 0)))
    grid = (padded // tb,)

    # Explicit scoped-VMEM limit (v5e default is only 16 MiB; v7x physical 64).
    vmem_est = 2 * tb * (128 + od_pad) * 4 + (2 << 20)
    vmem_limit = int(min(max(vmem_est, 32 << 20), 48 << 20))

    flops = 2 * padded * (2 * 128 + 128 * 64 + 64 * od_pad)
    bytes_accessed = (padded * 2 + padded * od_pad
                      + 2 * 128 + 128 + 128 * 64 + 64 + 64 * od_pad + od_pad) * 4

    def pinned(shape):
        return pl.BlockSpec(shape, lambda i: (0, 0))

    out = pl.pallas_call(
        mlp_kernel,
        out_shape=jax.ShapeDtypeStruct((padded, od_pad), jnp.float32),
        grid=grid,
        in_specs=[
            pl.BlockSpec((tb, 2), lambda i: (i, 0)),   # EF  (tiled over batch)
            pinned((2, 128)),                          # Wcat (VMEM-resident)
            pinned((1, 128)),                          # bcat
            pinned((128, 64)),                         # w1
            pinned((1, 64)),                           # b1
            pinned((64, od_pad)),                      # w2 (lane-padded)
            pinned((1, od_pad)),                       # b2 (lane-padded)
        ],
        out_specs=pl.BlockSpec((tb, od_pad), lambda i: (i, 0)),
        compiler_params=pltpu.CompilerParams(
            dimension_semantics=("parallel",),
            vmem_limit_bytes=vmem_limit),
        cost_estimate=pl.CostEstimate(flops=flops, transcendentals=0,
                                      bytes_accessed=bytes_accessed),
    )(ef, w_cat, b_cat, params["w1"], params["b1"], w2p, b2p)

    return out[:batch, :out_dim]


def init_params(key, output_dim):
    """Deterministic parameter init mirroring the nn.Linear shapes.

    PyTorch weights are (out, in); we store them transposed as (in, out).
    """
    ks = jax.random.split(key, 8)

    def u(k, shape, fan_in):
        bound = 1.0 / jnp.sqrt(fan_in)
        return jax.random.uniform(k, shape, jnp.float32, -bound, bound)

    return {
        "wE": u(ks[0], (1, 64), 1.0),             # fc_E1.weight.T
        "bE": u(ks[1], (1, 64), 1.0),             # fc_E1.bias
        "wF": u(ks[2], (1, 64), 1.0),             # fc_F1.weight.T
        "bF": u(ks[3], (1, 64), 1.0),             # fc_F1.bias
        "w1": u(ks[4], (128, 64), 128.0),         # fc1.weight.T
        "b1": u(ks[5], (1, 64), 128.0),           # fc1.bias
        "w2": u(ks[6], (64, output_dim), 64.0),   # fc2.weight.T
        "b2": u(ks[7], (1, output_dim), 64.0),    # fc2.bias
    }


def reference_forward(E, F, params):
    x_e = jnp.maximum(E @ params["wE"] + params["bE"], 0.0)
    x_f = jnp.maximum(F @ params["wF"] + params["bF"], 0.0)
    x = jnp.concatenate([x_e, x_f], axis=1)
    h = jnp.maximum(x @ params["w1"] + params["b1"], 0.0)
    return h @ params["w2"] + params["b2"]


if __name__ == "__main__":
    output_dim = 16
    key = jax.random.PRNGKey(0)
    k_params, k_small, k_big = jax.random.split(key, 3)
    params = init_params(k_params, output_dim)

    def make_inputs(k, batch):
        ks = jax.random.split(k, 9)
        return [jax.random.normal(ks[i], (batch, 1), jnp.float32)
                for i in range(9)]

    # Small smoke test (batch=8, single grid step).
    A, B, C, D, E, F, G, H, I = make_inputs(k_small, 8)
    out = jax.block_until_ready(
        mlp_model2_forward(A, B, C, D, E, F, G, H, I, params))
    ref = reference_forward(E, F, params)
    assert out.shape == (8, output_dim)
    assert jnp.allclose(out, ref, atol=1e-5, rtol=1e-5), "mismatch (small)"

    # Multi-tile, ragged-batch test (exercises pipelining, padding, >=2 steps).
    A, B, C, D, E, F, G, H, I = make_inputs(k_big, 1000)
    out = jax.block_until_ready(
        mlp_model2_forward(A, B, C, D, E, F, G, H, I, params, block_batch=512))
    ref = reference_forward(E, F, params)
    assert out.shape == (1000, output_dim)
    assert jnp.allclose(out, ref, atol=1e-5, rtol=1e-5), "mismatch (multi-tile)"

    print("KERNEL_OK")
</pallas_src>

<mosaic_0001>
module attributes {stable_mosaic.version = 11 : i64} {
  func.func @mlp_kernel(%arg0: i32, %arg1: memref<256x2xf32, #tpu.memory_space<vmem>>, %arg2: memref<2x128xf32, #tpu.memory_space<vmem>>, %arg3: memref<1x128xf32, #tpu.memory_space<vmem>>, %arg4: memref<128x64xf32, #tpu.memory_space<vmem>>, %arg5: memref<1x64xf32, #tpu.memory_space<vmem>>, %arg6: memref<64x128xf32, #tpu.memory_space<vmem>>, %arg7: memref<1x128xf32, #tpu.memory_space<vmem>>, %arg8: memref<256x128xf32, #tpu.memory_space<vmem>>) attributes {dimension_semantics = [#tpu.dimension_semantics<parallel>], iteration_bounds = array<i64: 1>, scalar_prefetch = 0 : i64, scratch_operands = 0 : i64, tpu.core_type = #tpu.core_type<tc>, window_params = [{transform_indices = @transform_0, window_bounds = array<i64: 256, 2>}, {pipeline_mode = #tpu.pipeline_mode<synchronous>, transform_indices = @transform_1, window_bounds = array<i64: 2, 128>}, {pipeline_mode = #tpu.pipeline_mode<synchronous>, transform_indices = @transform_2, window_bounds = array<i64: 1, 128>}, {pipeline_mode = #tpu.pipeline_mode<synchronous>, transform_indices = @transform_3, window_bounds = array<i64: 128, 64>}, {pipeline_mode = #tpu.pipeline_mode<synchronous>, transform_indices = @transform_4, window_bounds = array<i64: 1, 64>}, {pipeline_mode = #tpu.pipeline_mode<synchronous>, transform_indices = @transform_5, window_bounds = array<i64: 64, 128>}, {pipeline_mode = #tpu.pipeline_mode<synchronous>, transform_indices = @transform_6, window_bounds = array<i64: 1, 128>}, {transform_indices = @transform_7, window_bounds = array<i64: 256, 128>}]} {
    %c0 = arith.constant 0 : index
    %c0_0 = arith.constant 0 : index
    %0 = vector.load %arg2[%c0, %c0_0] : memref<2x128xf32, #tpu.memory_space<vmem>>, vector<2x128xf32>
    %c0_1 = arith.constant 0 : index
    %c0_2 = arith.constant 0 : index
    %1 = vector.load %arg3[%c0_1, %c0_2] : memref<1x128xf32, #tpu.memory_space<vmem>>, vector<1x128xf32>
    %c0_3 = arith.constant 0 : index
    %c0_4 = arith.constant 0 : index
    %2 = vector.load %arg4[%c0_3, %c0_4] : memref<128x64xf32, #tpu.memory_space<vmem>>, vector<128x64xf32>
    %c0_5 = arith.constant 0 : index
    %c0_6 = arith.constant 0 : index
    %3 = vector.load %arg5[%c0_5, %c0_6] : memref<1x64xf32, #tpu.memory_space<vmem>>, vector<1x64xf32>
    %c0_7 = arith.constant 0 : index
    %c0_8 = arith.constant 0 : index
    %4 = vector.load %arg6[%c0_7, %c0_8] : memref<64x128xf32, #tpu.memory_space<vmem>>, vector<64x128xf32>
    %c0_9 = arith.constant 0 : index
    %c0_10 = arith.constant 0 : index
    %5 = vector.load %arg7[%c0_9, %c0_10] : memref<1x128xf32, #tpu.memory_space<vmem>>, vector<1x128xf32>
    %c0_i32 = arith.constant 0 : i32
    %c128_i32 = arith.constant 128 : i32
    %6 = arith.muli %c0_i32, %c128_i32 : i32
    %7 = tpu.assume_multiple %6, 128 : i32
    %8 = arith.index_cast %7 : i32 to index
    %c0_11 = arith.constant 0 : index
    %9 = vector.load %arg1[%8, %c0_11] : memref<256x2xf32, #tpu.memory_space<vmem>>, vector<128x2xf32>
    %cst = arith.constant dense<0.000000e+00> : vector<128x128xf32>
    %10 = tpu.matmul %9, %0, %cst {dimension_numbers = #tpu.dot_dimension_numbers<[1], [0], [0], [1], [0, 0, 1, 1], [], []>} : vector<128x2xf32>, vector<2x128xf32>, vector<128x128xf32> -> vector<128x128xf32>
    %11 = vector.broadcast %1 : vector<1x128xf32> to vector<128x128xf32>
    %12 = arith.addf %10, %11 : vector<128x128xf32>
    %cst_12 = arith.constant 0.000000e+00 : f32
    %13 = vector.broadcast %cst_12 : f32 to vector<128x128xf32>
    %14 = arith.maximumf %12, %13 : vector<128x128xf32>
    %cst_13 = arith.constant dense<0.000000e+00> : vector<128x64xf32>
    %15 = tpu.matmul %14, %2, %cst_13 {dimension_numbers = #tpu.dot_dimension_numbers<[1], [0], [0], [1], [0, 0, 1, 1], [], []>} : vector<128x128xf32>, vector<128x64xf32>, vector<128x64xf32> -> vector<128x64xf32>
    %16 = vector.broadcast %3 : vector<1x64xf32> to vector<128x64xf32>
    %17 = arith.addf %15, %16 : vector<128x64xf32>
    %cst_14 = arith.constant 0.000000e+00 : f32
    %18 = vector.broadcast %cst_14 : f32 to vector<128x64xf32>
    %19 = arith.maximumf %17, %18 : vector<128x64xf32>
    %cst_15 = arith.constant dense<0.000000e+00> : vector<128x128xf32>
    %20 = tpu.matmul %19, %4, %cst_15 {dimension_numbers = #tpu.dot_dimension_numbers<[1], [0], [0], [1], [0, 0, 1, 1], [], []>} : vector<128x64xf32>, vector<64x128xf32>, vector<128x128xf32> -> vector<128x128xf32>
    %21 = vector.broadcast %5 : vector<1x128xf32> to vector<128x128xf32>
    %22 = arith.addf %20, %21 : vector<128x128xf32>
    %23 = arith.index_cast %7 : i32 to index
    %c0_16 = arith.constant 0 : index
    %24 = vector.load %arg8[%23, %c0_16] : memref<256x128xf32, #tpu.memory_space<vmem>>, vector<128x128xf32>
    tpu.vector_store %arg8[%23, %c0_16], %22 {strides = array<i32>} : memref<256x128xf32, #tpu.memory_space<vmem>>, vector<128x128xf32>,
    %c1_i32 = arith.constant 1 : i32
    %c128_i32_17 = arith.constant 128 : i32
    %25 = arith.muli %c1_i32, %c128_i32_17 : i32
    %26 = tpu.assume_multiple %25, 128 : i32
    %27 = arith.index_cast %26 : i32 to index
    %c0_18 = arith.constant 0 : index
    %28 = vector.load %arg1[%27, %c0_18] : memref<256x2xf32, #tpu.memory_space<vmem>>, vector<128x2xf32>
    %cst_19 = arith.constant dense<0.000000e+00> : vector<128x128xf32>
    %29 = tpu.matmul %28, %0, %cst_19 {dimension_numbers = #tpu.dot_dimension_numbers<[1], [0], [0], [1], [0, 0, 1, 1], [], []>} : vector<128x2xf32>, vector<2x128xf32>, vector<128x128xf32> -> vector<128x128xf32>
    %30 = vector.broadcast %1 : vector<1x128xf32> to vector<128x128xf32>
    %31 = arith.addf %29, %30 : vector<128x128xf32>
    %cst_20 = arith.constant 0.000000e+00 : f32
    %32 = vector.broadcast %cst_20 : f32 to vector<128x128xf32>
    %33 = arith.maximumf %31, %32 : vector<128x128xf32>
    %cst_21 = arith.constant dense<0.000000e+00> : vector<128x64xf32>
    %34 = tpu.matmul %33, %2, %cst_21 {dimension_numbers = #tpu.dot_dimension_numbers<[1], [0], [0], [1], [0, 0, 1, 1], [], []>} : vector<128x128xf32>, vector<128x64xf32>, vector<128x64xf32> -> vector<128x64xf32>
    %35 = vector.broadcast %3 : vector<1x64xf32> to vector<128x64xf32>
    %36 = arith.addf %34, %35 : vector<128x64xf32>
    %cst_22 = arith.constant 0.000000e+00 : f32
    %37 = vector.broadcast %cst_22 : f32 to vector<128x64xf32>
    %38 = arith.maximumf %36, %37 : vector<128x64xf32>
    %cst_23 = arith.constant dense<0.000000e+00> : vector<128x128xf32>
    %39 = tpu.matmul %38, %4, %cst_23 {dimension_numbers = #tpu.dot_dimension_numbers<[1], [0], [0], [1], [0, 0, 1, 1], [], []>} : vector<128x64xf32>, vector<64x128xf32>, vector<128x128xf32> -> vector<128x128xf32>
    %40 = vector.broadcast %5 : vector<1x128xf32> to vector<128x128xf32>
    %41 = arith.addf %39, %40 : vector<128x128xf32>
    %42 = arith.index_cast %26 : i32 to index
    %c0_24 = arith.constant 0 : index
    %43 = vector.load %arg8[%42, %c0_24] : memref<256x128xf32, #tpu.memory_space<vmem>>, vector<128x128xf32>
    tpu.vector_store %arg8[%42, %c0_24], %41 {strides = array<i32>} : memref<256x128xf32, #tpu.memory_space<vmem>>, vector<128x128xf32>,
    %c2_i32 = arith.constant 2 : i32
    return
  }
  func.func @transform_0(%arg0: i32) -> (i32, i32) {
    %c0_i32 = arith.constant 0 : i32
    %c0_i32_0 = arith.constant 0 : i32
    return %arg0, %c0_i32 : i32, i32
  }
  func.func @transform_1(%arg0: i32) -> (i32, i32) {
    %c0_i32 = arith.constant 0 : i32
    %c0_i32_0 = arith.constant 0 : i32
    %c0_i32_1 = arith.constant 0 : i32
    return %c0_i32, %c0_i32_0 : i32, i32
  }
  func.func @transform_2(%arg0: i32) -> (i32, i32) {
    %c0_i32 = arith.constant 0 : i32
    %c0_i32_0 = arith.constant 0 : i32
    %c0_i32_1 = arith.constant 0 : i32
    return %c0_i32, %c0_i32_0 : i32, i32
  }
  func.func @transform_3(%arg0: i32) -> (i32, i32) {
    %c0_i32 = arith.constant 0 : i32
    %c0_i32_0 = arith.constant 0 : i32
    %c0_i32_1 = arith.constant 0 : i32
    return %c0_i32, %c0_i32_0 : i32, i32
  }
  func.func @transform_4(%arg0: i32) -> (i32, i32) {
    %c0_i32 = arith.constant 0 : i32
    %c0_i32_0 = arith.constant 0 : i32
    %c0_i32_1 = arith.constant 0 : i32
    return %c0_i32, %c0_i32_0 : i32, i32
  }
  func.func @transform_5(%arg0: i32) -> (i32, i32) {
    %c0_i32 = arith.constant 0 : i32
    %c0_i32_0 = arith.constant 0 : i32
    %c0_i32_1 = arith.constant 0 : i32
    return %c0_i32, %c0_i32_0 : i32, i32
  }
  func.func @transform_6(%arg0: i32) -> (i32, i32) {
    %c0_i32 = arith.constant 0 : i32
    %c0_i32_0 = arith.constant 0 : i32
    %c0_i32_1 = arith.constant 0 : i32
    return %c0_i32, %c0_i32_0 : i32, i32
  }
  func.func @transform_7(%arg0: i32) -> (i32, i32) {
    %c0_i32 = arith.constant 0 : i32
    %c0_i32_0 = arith.constant 0 : i32
    return %arg0, %c0_i32 : i32, i32
  }
}

</mosaic_0001>

<bundles_post_ra>
// kernel: tpu_custom_call.1
= control target key start
LH: loop header
LB: loop body
LE: loop exit
PB: predicated region body
PF: predicated region fallthrough
CT: control target
= control target key end

     0   :  { %vm126_vm0 = vcmask 1041408   ;;  %vm77_vm1 = vcmask 15360   ;;  %s2384_s0 = inlined_call_operand.vmem [shape: f32[256,2], index: 0, kind: input, shape index: {}]   ;;  %s2385_s1 = inlined_call_operand.vmem [shape: f32[2,128], index: 1, kind: input, shape index: {}]   ;;  %s2386_s2 = inlined_call_operand.vmem [shape: f32[1,128], index: 2, kind: input, shape index: {}]   ;;  %s2387_s3 = inlined_call_operand.vmem [shape: f32[128,64], index: 3, kind: input, shape index: {}]   ;;  %s2388_s4 = inlined_call_operand.vmem [shape: f32[1,64], index: 4, kind: input, shape index: {}]   ;;  %s2389_s5 = inlined_call_operand.vmem [shape: f32[64,128], index: 5, kind: input, shape index: {}]   ;;  %s2390_s6 = inlined_call_operand.vmem [shape: f32[1,128], index: 6, kind: input, shape index: {}]   ;;  %s2391_s7 = inlined_call_operand.hbm [shape: f32[256,128], index: 7, kind: output, shape index: {}]  }
   0x1   :  { %v1939_v0 = vld [vmem:[%s2385_s1] sm:$0x3]  ;;  %v56_v2 = vld [vmem:[%s2384_s0 + $0x8] sm:$0xff]  ;;  %v57_v3 = vld [vmem:[%s2384_s0 + $0x10] sm:$0xff] }
   0x2   :  { %v55_v1 = vld [vmem:[%s2384_s0] sm:$0xff]  ;;  %1518 = vmatprep.subr.msk.mxu0 %vm126_vm0, %v1939_v0  ;;  %v58_v4 = vld [vmem:[%s2384_s0 + $0x18] sm:$0xff]  ;;  %v30_v7 = vld [vmem:[%s2387_s3 + $0x8] sm:$0xff] }
   0x3   :  { %1520 = vmatprep.mubr.msk.f32.mxu0 %vm77_vm1, %v55_v1  ;;  %1519 = vmatpush3.msk.msra.mxu0 %vm126_vm0, %v1939_v0  ;;  %v59_v5 = vld [vmem:[%s2384_s0 + $0x20] sm:$0xff]  ;;  %v31_v8 = vld [vmem:[%s2387_s3 + $0x10] sm:$0xff]  ;;  %v32_v9 = vld [vmem:[%s2387_s3 + $0x18] sm:$0xff] }
   0x4   :  { %1521 = vmatmul.mubr.msk.f32.vlgmr.msra.gmra.mrb[0].mxu0 %vm77_vm1, %v56_v2  ;;  %v29_v6 = vld [vmem:[%s2387_s3] sm:$0xff]  ;;  %v1978_v11 = vpack.c.bf16 %v32_v9, %v31_v8  ;;  %v60_v12 = vld [vmem:[%s2384_s0 + $0x28] sm:$0xff]  ;;  %v61_v15 = vld [vmem:[%s2384_s0 + $0x30] sm:$0xff] }
   0x5   :  { %1523 = vmatprep.mubr.msk.f32.mxu0 %vm77_vm1, %v57_v3  ;;  %v1976_v10 = vpack.c.bf16 %v30_v7, %v29_v6  ;;  %v33_v13 = vld [vmem:[%s2387_s3 + $0x20] sm:$0xff]  ;;  %v34_v14 = vld [vmem:[%s2387_s3 + $0x28] sm:$0xff] }
   0x7   :  { %1763 = vmatprep.subr.bf16.mxu1 %v1976_v10 }
   0x8   :  { %1524 = vmatmul.mubr.msk.f32.gmra.mrb[2].mxu0 %vm77_vm1, %v58_v4  ;;  %1765 = vmatpush3.bf16.msra.mxu1 %v1976_v10 }
   0x9   :  { %1526 = vmatprep.mubr.msk.f32.mxu0 %vm77_vm1, %v59_v5 }
   0xa   :  { %12 = vsyncpa [#allocation3], 0  ;;  %1767 = vmatprep.subr.bf16.mxu1 %v1978_v11  ;;  %v1997_v16 = vpack.c.bf16 %v34_v14, %v33_v13  ;;  %v62_v17 = vld [vmem:[%s2384_s0 + $0x38] sm:$0xff]  ;;  %v35_v18 = vld [vmem:[%s2387_s3 + $0x30] sm:$0xff]  ;;  %vm464_vm2 = vcmask 523264  }
   0xb   :  { %v36_v19 = vld [vmem:[%s2387_s3 + $0x38] sm:$0xff]  ;;  %v63_v20 = vld [vmem:[%s2384_s0 + $0x40] sm:$0xff]  ;;  %v64_v22 = vld [vmem:[%s2384_s0 + $0x48] sm:$0xff] }
   0xc   :  { %1527 = vmatmul.mubr.msk.f32.gmra.mrb[4].mxu0 %vm77_vm1, %v60_v12  ;;  %1769 = vmatpush3.bf16.msra.mxu1 %v1978_v11  ;;  %v2015_v21 = vpack.c.bf16 %v36_v19, %v35_v18  ;;  %v37_v23 = vld [vmem:[%s2387_s3 + $0x40] sm:$0xff]  ;;  %v38_v24 = vld [vmem:[%s2387_s3 + $0x48] sm:$0xff]  ;;  %v65_v25 = vld [vmem:[%s2384_s0 + $0x50] sm:$0xff] }
   0xd   :  { %1529 = vmatprep.mubr.msk.f32.mxu0 %vm77_vm1, %v61_v15  ;;  %1771 = vmatprep.subr.bf16.mxu1 %v1997_v16  ;;  %v2033_v26 = vpack.c.bf16 %v38_v24, %v37_v23  ;;  %v66_v27 = vld [vmem:[%s2384_s0 + $0x58] sm:$0xff]  ;;  %v39_v28 = vld [vmem:[%s2387_s3 + $0x50] sm:$0xff]  ;;  %v67_v30 = vld [vmem:[%s2384_s0 + $0x60] sm:$0xff] }
   0xe   :  { %v40_v29 = vld [vmem:[%s2387_s3 + $0x58] sm:$0xff]  ;;  %v68_v32 = vld [vmem:[%s2384_s0 + $0x68] sm:$0xff]  ;;  %v41_v33 = vld [vmem:[%s2387_s3 + $0x60] sm:$0xff] }
   0xf   :  { %v2051_v31 = vpack.c.bf16 %v40_v29, %v39_v28  ;;  %v42_v34 = vld [vmem:[%s2387_s3 + $0x68] sm:$0xff]  ;;  %v69_v35 = vld [vmem:[%s2384_s0 + $0x70] sm:$0xff]  ;;  %v70_v37 = vld [vmem:[%s2384_s0 + $0x78] sm:$0xff] }
  0x10   :  { %1530 = vmatmul.mubr.msk.f32.gmra.mrb[6].mxu0 %vm77_vm1, %v62_v17  ;;  %1773 = vmatpush3.bf16.msra.mxu1 %v1997_v16  ;;  %v2069_v36 = vpack.c.bf16 %v42_v34, %v41_v33  ;;  %v43_v38 = vld [vmem:[%s2387_s3 + $0x70] sm:$0xff]  ;;  %v44_v39 = vld [vmem:[%s2387_s3 + $0x78] sm:$0xff]  ;;  %v46_v41 = vld [vmem:[%s2389_s5] sm:$0xff] }
  0x11   :  { %1532 = vmatprep.mubr.msk.f32.mxu0 %vm77_vm1, %v63_v20  ;;  %1775 = vmatprep.subr.bf16.mxu1 %v2015_v21  ;;  %v2085_v40 = vpack.c.bf16 %v44_v39, %v43_v38  ;;  %v47_v42 = vld [vmem:[%s2389_s5 + $0x8] sm:$0xff]  ;;  %v48_v43 = vld [vmem:[%s2389_s5 + $0x10] sm:$0xff]  ;;  %v49_v45 = vld [vmem:[%s2389_s5 + $0x18] sm:$0xff] }
  0x12   :  { %v2100_v44 = vpack.c.bf16 %v47_v42, %v46_v41  ;;  %v2105_v46 = vpack.c.bf16 %v49_v45, %v48_v43  ;;  %v50_v47 = vld [vmem:[%s2389_s5 + $0x20] sm:$0xff]  ;;  %v51_v48 = vld [vmem:[%s2389_s5 + $0x28] sm:$0xff]  ;;  %v52_v50 = vld [vmem:[%s2389_s5 + $0x30] sm:$0xff] }
  0x13   :  { %v2116_v49 = vpack.c.bf16 %v51_v48, %v50_v47  ;;  %v53_v51 = vld [vmem:[%s2389_s5 + $0x38] sm:$0xff]  ;;  %v2135_v53 = vld [vmem:[%s2386_s2] ss:$0 sm:$0xff] }
  0x14   :  { %1533 = vmatmul.mubr.msk.f32.gmra.mrb[8].mxu0 %vm77_vm1, %v64_v22  ;;  %1777 = vmatpush3.bf16.msra.mxu1 %v2015_v21  ;;  %v2126_v52 = vpack.c.bf16 %v53_v51, %v52_v50  ;;  %v1323_v48 = vld [vmem:[%s2384_s0 + $0x80] sm:$0xff]  ;;  %v1324_v50 = vld [vmem:[%s2384_s0 + $0x88] sm:$0xff]  ;;  %v1325_v51 = vld [vmem:[%s2384_s0 + $0x90] sm:$0xff] }
  0x15   :  { %1535 = vmatprep.mubr.msk.f32.mxu0 %vm77_vm1, %v65_v25  ;;  %1779 = vmatprep.subr.bf16.mxu1 %v2033_v26 }
  0x16   :  { %1795 = vmatprep.subr.bf16.mxu0 %v2100_v44 }
  0x17   :  { %1797 = vmatpush3.bf16.msra.mxu0 %v2100_v44 }
  0x18   :  { %1536 = vmatmul.mubr.msk.f32.gmra.mrb[10].mxu0 %vm77_vm1, %v66_v27  ;;  %1781 = vmatpush3.bf16.msra.mxu1 %v2033_v26 }
  0x19   :  { %1538 = vmatprep.mubr.msk.f32.mxu0 %vm77_vm1, %v67_v30  ;;  %1783 = vmatprep.subr.bf16.mxu1 %v2051_v31 }
  0x1a   :  { %1799 = vmatprep.subr.bf16.mxu0 %v2105_v46 }
  0x1b   :  { %1801 = vmatpush3.bf16.msra.mxu0 %v2105_v46 }
  0x1c   :  { %1539 = vmatmul.mubr.msk.f32.gmra.mrb[12].mxu0 %vm77_vm1, %v68_v32  ;;  %1785 = vmatpush3.bf16.msra.mxu1 %v2051_v31 }
  0x1d   :  { %1541 = vmatprep.mubr.msk.f32.mxu0 %vm77_vm1, %v69_v35  ;;  %1787 = vmatprep.subr.bf16.mxu1 %v2069_v36 }
  0x1e   :  { %1803 = vmatprep.subr.bf16.mxu0 %v2116_v49 }
  0x1f   :  { %1805 = vmatpush3.bf16.msra.mxu0 %v2116_v49 }
  0x20   :  { %1542 = vmatmul.mubr.msk.f32.gmra.mrb[14].mxu0 %vm77_vm1, %v70_v37  ;;  %1789 = vmatpush3.bf16.msra.mxu1 %v2069_v36 }
  0x21   :  { %1791 = vmatprep.subr.bf16.mxu1 %v2085_v40  ;;  %1807 = vmatprep.subr.bf16.mxu0 %v2126_v52 }
  0x23   :  { %1809 = vmatpush3.bf16.msra.mxu0 %v2126_v52 }
  0x24   :  { %1793 = vmatpush3.bf16.msra.mxu1 %v2085_v40  ;;  %1811 = vmatprep.subr.bf16.mxu0 %v1976_v10 }
  0x25   :  { %1640 = vmatprep.subr.msk.mxu1 %vm126_vm0, %v1939_v0 }
  0xd7   :  { %v1522_v54 = vpop.f32.mrb[0].mxu0 }
  0xd8   :  { %v202_v55 = vadd.f32 %v1522_v54, %v2135_v53  ;;  %v196_v56 = vpop.f32.mrb[1].mxu0  ;;  %v1326_v54 = vld [vmem:[%s2384_s0 + $0x98] sm:$0xff] }
  0xd9   :  { %v197_v57 = vadd.f32 %v2135_v53, %v196_v56  ;;  %v1328_v56 = vld [vmem:[%s2384_s0 + $0xa8] sm:$0xff] }
  0xda   :  { %v276_v60 = vmax.f32 %v202_v55, 0.0  ;;  %v1327_v55 = vld [vmem:[%s2384_s0 + $0xa0] sm:$0xff] }
  0xdb   :  { %v1525_v58 = vpop.f32.mrb[2].mxu0  ;;  %v275_v59 = vmax.f32 %v197_v57, 0.0  ;;  %v1329_v57 = vld [vmem:[%s2384_s0 + $0xb0] sm:$0xff] }
  0xdc   :  { %v212_v61 = vadd.f32 %v1525_v58, %v2135_v53  ;;  %v206_v62 = vpop.f32.mrb[3].mxu0  ;;  %v1330_v58 = vld [vmem:[%s2384_s0 + $0xb8] sm:$0xff] }
  0xdd   :  { %v207_v63 = vadd.f32 %v2135_v53, %v206_v62  ;;  %1576 = vmatprep.mubr.f32.mxu1 %v275_v59  ;;  %v1331_v59 = vld [vmem:[%s2384_s0 + $0xc0] sm:$0xff]  ;;  %v1334_v62 = vld [vmem:[%s2384_s0 + $0xd8] sm:$0xff] }
  0xde   :  { %1577 = vmatmul.mubr.f32.vlgmr.msra.gmra.mrb[0].mxu1 %v276_v60  ;;  %v278_v3 = vmax.f32 %v212_v61, 0.0  ;;  %v1332_v60 = vld [vmem:[%s2384_s0 + $0xc8] sm:$0xff]  ;;  %v1333_v61 = vld [vmem:[%s2384_s0 + $0xd0] sm:$0xff] }
  0xdf   :  { %v277_v1 = vmax.f32 %v207_v63, 0.0  ;;  %1641 = vmatpush3.msk.msra.mxu1 %vm126_vm0, %v1939_v0  ;;  %v1528_v2 = vpop.f32.mrb[4].mxu0  ;;  %v1335_v63 = vld [vmem:[%s2384_s0 + $0xe0] sm:$0xff] }
  0xe0   :  { %v222_v4 = vadd.f32 %v1528_v2, %v2135_v53  ;;  %v216_v5 = vpop.f32.mrb[5].mxu0  ;;  %1858 = vmatprep.subr.bf16.mxu1 %v2100_v44  ;;  %v1337_v2 = vld [vmem:[%s2384_s0 + $0xf0] sm:$0xff] }
  0xe1   :  { %v217_v6 = vadd.f32 %v2135_v53, %v216_v5  ;;  %1579 = vmatprep.mubr.f32.mxu1 %v277_v1  ;;  %v1336_v1 = vld [vmem:[%s2384_s0 + $0xe8] sm:$0xff] }
  0xe2   :  { %1580 = vmatmul.mubr.f32.gmra.mrb[2].mxu1 %v278_v3  ;;  %v280_v9 = vmax.f32 %v222_v4, 0.0  ;;  %v1338_v3 = vld [vmem:[%s2384_s0 + $0xf8] sm:$0xff]  ;;  %v2230_v4 = vld [vmem:[%s2388_s4] ss:$0 sm:$0xff] }
  0xe3   :  { %v279_v7 = vmax.f32 %v217_v6, 0.0  ;;  %v1531_v8 = vpop.f32.mrb[6].mxu0 }
  0xe4   :  { %v232_v12 = vadd.f32 %v1531_v8, %v2135_v53  ;;  %v226_v13 = vpop.f32.mrb[7].mxu0 }
  0xe5   :  { %v227_v14 = vadd.f32 %v2135_v53, %v226_v13  ;;  %1582 = vmatprep.mubr.f32.mxu1 %v279_v7 }
  0xe6   :  { %1583 = vmatmul.mubr.f32.gmra.mrb[4].mxu1 %v280_v9  ;;  %v282_v17 = vmax.f32 %v232_v12, 0.0 }
  0xe7   :  { %v281_v0 = vmax.f32 %v227_v14, 0.0  ;;  %v1534_v15 = vpop.f32.mrb[8].mxu0 }
  0xe8   :  { %v242_v18 = vadd.f32 %v1534_v15, %v2135_v53  ;;  %v236_v19 = vpop.f32.mrb[9].mxu0 }
  0xe9   :  { %v237_v20 = vadd.f32 %v2135_v53, %v236_v19  ;;  %1585 = vmatprep.mubr.f32.mxu1 %v281_v0 }
  0xea   :  { %1586 = vmatmul.mubr.f32.gmra.mrb[6].mxu1 %v282_v17  ;;  %v284_v24 = vmax.f32 %v242_v18, 0.0 }
  0xeb   :  { %v283_v22 = vmax.f32 %v237_v20, 0.0  ;;  %v1537_v23 = vpop.f32.mrb[10].mxu0 }
  0xec   :  { %v252_v25 = vadd.f32 %v1537_v23, %v2135_v53  ;;  %v246_v27 = vpop.f32.mrb[11].mxu0 }
  0xed   :  { %v247_v28 = vadd.f32 %v2135_v53, %v246_v27  ;;  %1588 = vmatprep.mubr.f32.mxu1 %v283_v22 }
  0xee   :  { %1589 = vmatmul.mubr.f32.gmra.mrb[8].mxu1 %v284_v24  ;;  %v286_v32 = vmax.f32 %v252_v25, 0.0 }
  0xef   :  { %v285_v29 = vmax.f32 %v247_v28, 0.0  ;;  %v1540_v30 = vpop.f32.mrb[12].mxu0 }
  0xf0   :  { %v262_v33 = vadd.f32 %v1540_v30, %v2135_v53  ;;  %v256_v34 = vpop.f32.mrb[13].mxu0 }
  0xf1   :  { %v257_v35 = vadd.f32 %v2135_v53, %v256_v34  ;;  %1591 = vmatprep.mubr.f32.mxu1 %v285_v29 }
  0xf2   :  { %1592 = vmatmul.mubr.f32.gmra.mrb[10].mxu1 %v286_v32  ;;  %v288_v39 = vmax.f32 %v262_v33, 0.0 }
  0xf3   :  { %v287_v37 = vmax.f32 %v257_v35, 0.0  ;;  %v1543_v38 = vpop.f32.mrb[14].mxu0 }
  0xf4   :  { %v272_v41 = vadd.f32 %v1543_v38, %v2135_v53  ;;  %v266_v42 = vpop.f32.mrb[15].mxu0 }
  0xf5   :  { %v267_v43 = vadd.f32 %v2135_v53, %v266_v42  ;;  %1594 = vmatprep.mubr.f32.mxu1 %v287_v37 }
  0xf6   :  { %1595 = vmatmul.mubr.f32.gmra.mrb[12].mxu1 %v288_v39  ;;  %v290_v47 = vmax.f32 %v272_v41, 0.0 }
  0xf7   :  { %v289_v45 = vmax.f32 %v267_v43, 0.0 }
  0xf9   :  { %1597 = vmatprep.mubr.f32.mxu1 %v289_v45 }
  0xfa   :  { %1598 = vmatmul.mubr.f32.gmra.mrb[14].mxu1 %v290_v47 }
  0xfb   :  { %1642 = vmatprep.mubr.msk.f32.mxu1 %vm77_vm1, %v1323_v48 }
  0xfe   :  { %1643 = vmatmul.mubr.msk.f32.vlgmr.msra.gmra.mrb[16].mxu1 %vm77_vm1, %v1324_v50 }
  0xff   :  { %1645 = vmatprep.mubr.msk.f32.mxu1 %vm77_vm1, %v1325_v51  ;;  %1862 = vmatpush3.bf16.msra.mxu1 %v2100_v44 }
 0x100   :  { %1859 = vmatprep.subr.bf16.mxu1 %v2105_v46 }
 0x102   :  { %1646 = vmatmul.mubr.msk.f32.gmra.mrb[18].mxu1 %vm77_vm1, %v1326_v54 }
 0x103   :  { %1648 = vmatprep.mubr.msk.f32.mxu1 %vm77_vm1, %v1327_v55  ;;  %1863 = vmatpush3.bf16.msra.mxu1 %v2105_v46 }
 0x104   :  { %1860 = vmatprep.subr.bf16.mxu1 %v2116_v49 }
 0x106   :  { %1649 = vmatmul.mubr.msk.f32.gmra.mrb[20].mxu1 %vm77_vm1, %v1328_v56 }
 0x107   :  { %1651 = vmatprep.mubr.msk.f32.mxu1 %vm77_vm1, %v1329_v57  ;;  %1864 = vmatpush3.bf16.msra.mxu1 %v2116_v49 }
 0x108   :  { %1861 = vmatprep.subr.bf16.mxu1 %v2126_v52 }
 0x10a   :  { %1652 = vmatmul.mubr.msk.f32.gmra.mrb[22].mxu1 %vm77_vm1, %v1330_v58 }
 0x10b   :  { %1654 = vmatprep.mubr.msk.f32.mxu1 %vm77_vm1, %v1331_v59  ;;  %1865 = vmatpush3.bf16.msra.mxu1 %v2126_v52 }
 0x10e   :  { %1655 = vmatmul.mubr.msk.f32.gmra.mrb[24].mxu1 %vm77_vm1, %v1332_v60 }
 0x10f   :  { %1657 = vmatprep.mubr.msk.f32.mxu1 %vm77_vm1, %v1333_v61 }
 0x112   :  { %1658 = vmatmul.mubr.msk.f32.gmra.mrb[26].mxu1 %vm77_vm1, %v1334_v62 }
 0x113   :  { %1660 = vmatprep.mubr.msk.f32.mxu1 %vm77_vm1, %v1335_v63 }
 0x116   :  { %1661 = vmatmul.mubr.msk.f32.gmra.mrb[28].mxu1 %vm77_vm1, %v1336_v1 }
 0x117   :  { %1663 = vmatprep.mubr.msk.f32.mxu1 %vm77_vm1, %v1337_v2 }
 0x11a   :  { %1664 = vmatmul.mubr.msk.f32.gmra.mrb[30].mxu1 %vm77_vm1, %v1338_v3 }
 0x1b1   :  { %v1578_v5 = vpop.f32.mrb[0].mxu1 }
 0x1b2   :  { %v369_v6 = vadd.f32 %v1578_v5, %v2230_v4  ;;  %v363_v7 = vpop.f32.mrb[1].mxu1 }
 0x1b3   :  { %v364_v8 = vadd.f32 %v2230_v4, %v363_v7 }
 0x1b4   :  { %v443_v13 = vmax.f32 %v369_v6, 0.0 }
 0x1b5   :  { %v442_v9 = vmax.f32 %v364_v8, 0.0  ;;  %v1581_v12 = vpop.f32.mrb[2].mxu1 }
 0x1b6   :  { %v379_v14 = vadd.f32 %v1581_v12, %v2230_v4  ;;  %v373_v0 = vpop.f32.mrb[3].mxu1 }
 0x1b7   :  { %v374_v15 = vadd.f32 %v2230_v4, %v373_v0  ;;  %1616 = vmatprep.mubr.msk.f32.mxu0 %vm464_vm2, %v442_v9 }
 0x1b8   :  { %1617 = vmatmul.mubr.msk.f32.vlgmr.msra.gmra.mrb[16].mxu0 %vm464_vm2, %v443_v13  ;;  %v445_v19 = vmax.f32 %v379_v14, 0.0 }
 0x1b9   :  { %v444_v17 = vmax.f32 %v374_v15, 0.0  ;;  %1813 = vmatpush3.bf16.msra.mxu0 %v1976_v10  ;;  %v1584_v18 = vpop.f32.mrb[4].mxu1 }
 0x1ba   :  { %v389_v20 = vadd.f32 %v1584_v18, %v2230_v4  ;;  %v383_v22 = vpop.f32.mrb[5].mxu1  ;;  %1815 = vmatprep.subr.bf16.mxu0 %v1978_v11 }
 0x1bb   :  { %v384_v23 = vadd.f32 %v2230_v4, %v383_v22  ;;  %1619 = vmatprep.mubr.msk.f32.mxu0 %vm464_vm2, %v444_v17 }
 0x1bc   :  { %1620 = vmatmul.mubr.msk.f32.gmra.mrb[18].mxu0 %vm464_vm2, %v445_v19  ;;  %v447_v27 = vmax.f32 %v389_v20, 0.0 }
 0x1bd   :  { %v446_v24 = vmax.f32 %v384_v23, 0.0  ;;  %1817 = vmatpush3.bf16.msra.mxu0 %v1978_v11  ;;  %v1587_v25 = vpop.f32.mrb[6].mxu1 }
 0x1be   :  { %v399_v10 = vadd.f32 %v1587_v25, %v2230_v4  ;;  %v393_v28 = vpop.f32.mrb[7].mxu1  ;;  %1819 = vmatprep.subr.bf16.mxu0 %v1997_v16 }
 0x1bf   :  { %v394_v29 = vadd.f32 %v2230_v4, %v393_v28  ;;  %1622 = vmatprep.mubr.msk.f32.mxu0 %vm464_vm2, %v446_v24 }
 0x1c0   :  { %1623 = vmatmul.mubr.msk.f32.gmra.mrb[20].mxu0 %vm464_vm2, %v447_v27  ;;  %v449_v33 = vmax.f32 %v399_v10, 0.0 }
 0x1c1   :  { %v448_v30 = vmax.f32 %v394_v29, 0.0  ;;  %1821 = vmatpush3.bf16.msra.mxu0 %v1997_v16  ;;  %v1590_v32 = vpop.f32.mrb[8].mxu1 }
 0x1c2   :  { %v409_v11 = vadd.f32 %v1590_v32, %v2230_v4  ;;  %v403_v34 = vpop.f32.mrb[9].mxu1  ;;  %1823 = vmatprep.subr.bf16.mxu0 %v2015_v21 }
 0x1c3   :  { %v404_v35 = vadd.f32 %v2230_v4, %v403_v34  ;;  %1625 = vmatprep.mubr.msk.f32.mxu0 %vm464_vm2, %v448_v30 }
 0x1c4   :  { %1626 = vmatmul.mubr.msk.f32.gmra.mrb[22].mxu0 %vm464_vm2, %v449_v33  ;;  %v451_v39 = vmax.f32 %v409_v11, 0.0 }
 0x1c5   :  { %v450_v37 = vmax.f32 %v404_v35, 0.0  ;;  %1825 = vmatpush3.bf16.msra.mxu0 %v2015_v21  ;;  %v1593_v38 = vpop.f32.mrb[10].mxu1 }
 0x1c6   :  { %v419_v16 = vadd.f32 %v1593_v38, %v2230_v4  ;;  %v413_v41 = vpop.f32.mrb[11].mxu1  ;;  %1827 = vmatprep.subr.bf16.mxu0 %v2033_v26 }
 0x1c7   :  { %v414_v42 = vadd.f32 %v2230_v4, %v413_v41  ;;  %1628 = vmatprep.mubr.msk.f32.mxu0 %vm464_vm2, %v450_v37 }
 0x1c8   :  { %1629 = vmatmul.mubr.msk.f32.gmra.mrb[24].mxu0 %vm464_vm2, %v451_v39  ;;  %v453_v47 = vmax.f32 %v419_v16, 0.0 }
 0x1c9   :  { %v452_v43 = vmax.f32 %v414_v42, 0.0  ;;  %1829 = vmatpush3.bf16.msra.mxu0 %v2033_v26  ;;  %v1596_v45 = vpop.f32.mrb[12].mxu1 }
 0x1ca   :  { %v429_v21 = vadd.f32 %v1596_v45, %v2230_v4  ;;  %v423_v48 = vpop.f32.mrb[13].mxu1  ;;  %1831 = vmatprep.subr.bf16.mxu0 %v2051_v31 }
 0x1cb   :  { %v424_v50 = vadd.f32 %v2230_v4, %v423_v48  ;;  %1631 = vmatprep.mubr.msk.f32.mxu0 %vm464_vm2, %v452_v43  ;;  %v2306_v43 = vld [vmem:[%s2390_s6] ss:$0 sm:$0xff]  ;;  %s1893_s6 = smov [#allocation2]  }
 0x1cc   :  { %1632 = vmatmul.mubr.msk.f32.gmra.mrb[26].mxu0 %vm464_vm2, %v453_v47  ;;  %v455_v55 = vmax.f32 %v429_v21, 0.0  ;;  %s1276_s16 = sshll.u32 %s1893_s6, 4  ;;  %s1277_s16 = int_to_ptr.vmem [resolvable:$true] %s1276_s16 }
 0x1cd   :  { %v454_v51 = vmax.f32 %v424_v50, 0.0  ;;  %1833 = vmatpush3.bf16.msra.mxu0 %v2051_v31  ;;  %v1599_v54 = vpop.f32.mrb[14].mxu1  ;;  %s1869_s17 = scalar_lea.vmem %s1277_s16, 4096  ;;  %p1874_p1 = scmp.lt.s32.totalorder %s1277_s16, %s1277_s16 }
 0x1ce   :  { %v439_v26 = vadd.f32 %v1599_v54, %v2230_v4  ;;  %v433_v56 = vpop.f32.mrb[15].mxu1  ;;  %1835 = vmatprep.subr.bf16.mxu0 %v2069_v36  ;;  %p1870_p0 = scmp.ne.s32.totalorder %s1277_s16, %s1869_s17  ;;  %p1875_p2 = scmp.lt.s32.totalorder %s1869_s17, %s1869_s17 }
 0x1cf   :  { %v434_v57 = vadd.f32 %v2230_v4, %v433_v56  ;;  %1634 = vmatprep.mubr.msk.f32.mxu0 %vm464_vm2, %v454_v51 }
 0x1d0   :  { %1635 = vmatmul.mubr.msk.f32.gmra.mrb[28].mxu0 %vm464_vm2, %v455_v55  ;;  %v457_v60 = vmax.f32 %v439_v26, 0.0  ;;  %p1876_p3 = por %p1875_p2, %p1874_p1 }
 0x1d1   :  { %v456_v58 = vmax.f32 %v434_v57, 0.0  ;;  %1837 = vmatpush3.bf16.msra.mxu0 %v2069_v36  ;;  %v1644_v59 = vpop.f32.mrb[16].mxu1 }
 0x1d2   :  { %v811_v31 = vadd.f32 %v1644_v59, %v2135_v53  ;;  %v805_v61 = vpop.f32.mrb[17].mxu1  ;;  %1839 = vmatprep.subr.bf16.mxu0 %v2085_v40  ;;  %p1877_p4 = pnand %p1876_p3, %p1870_p0 }
 0x1d3   :  { %v806_v62 = vadd.f32 %v2135_v53, %v805_v61  ;;  %1637 = vmatprep.mubr.msk.f32.mxu0 %vm464_vm2, %v456_v58 }
 0x1d4   :  { %1638 = vmatmul.mubr.msk.f32.gmra.mrb[30].mxu0 %vm464_vm2, %v457_v60  ;;  %v885_v2 = vmax.f32 %v811_v31, 0.0 }
 0x1d5   :  { %v884_v63 = vmax.f32 %v806_v62, 0.0  ;;  %1841 = vmatpush3.bf16.msra.mxu0 %v2085_v40  ;;  %v1647_v1 = vpop.f32.mrb[18].mxu1 }
 0x1d6   :  { %v821_v36 = vadd.f32 %v1647_v1, %v2135_v53  ;;  %v815_v3 = vpop.f32.mrb[19].mxu1  ;;  %1843 = vmatprep.subr.bf16.mxu0 %v2100_v44 }
 0x1d7   :  { %v816_v5 = vadd.f32 %v2135_v53, %v815_v3  ;;  %1698 = vmatprep.mubr.f32.mxu0 %v884_v63 }
 0x1d8   :  { %1699 = vmatmul.mubr.f32.vlgmr.msra.gmra.mrb[32].mxu0 %v885_v2  ;;  %v887_v8 = vmax.f32 %v821_v36, 0.0 }
 0x1d9   :  { %v886_v6 = vmax.f32 %v816_v5, 0.0  ;;  %v1650_v7 = vpop.f32.mrb[20].mxu1  ;;  %1845 = vmatpush3.bf16.msra.mxu0 %v2100_v44 }
 0x1da   :  { %v831_v9 = vadd.f32 %v1650_v7, %v2135_v53  ;;  %v825_v12 = vpop.f32.mrb[21].mxu1  ;;  %1847 = vmatprep.subr.bf16.mxu0 %v2105_v46 }
 0x1db   :  { %v826_v40 = vadd.f32 %v2135_v53, %v825_v12  ;;  %1701 = vmatprep.mubr.f32.mxu0 %v886_v6 }
 0x1dc   :  { %1702 = vmatmul.mubr.f32.gmra.mrb[34].mxu0 %v887_v8  ;;  %v889_v0 = vmax.f32 %v831_v9, 0.0 }
 0x1dd   :  { %v888_v13 = vmax.f32 %v826_v40, 0.0  ;;  %v1653_v14 = vpop.f32.mrb[22].mxu1  ;;  %1849 = vmatpush3.bf16.msra.mxu0 %v2105_v46 }
 0x1de   :  { %v841_v15 = vadd.f32 %v1653_v14, %v2135_v53  ;;  %v835_v17 = vpop.f32.mrb[23].mxu1  ;;  %1851 = vmatprep.subr.bf16.mxu0 %v2116_v49 }
 0x1df   :  { %v836_v44 = vadd.f32 %v2135_v53, %v835_v17  ;;  %1704 = vmatprep.mubr.f32.mxu0 %v888_v13 }
 0x1e0   :  { %1705 = vmatmul.mubr.f32.gmra.mrb[36].mxu0 %v889_v0  ;;  %v891_v20 = vmax.f32 %v841_v15, 0.0 }
 0x1e1   :  { %v890_v18 = vmax.f32 %v836_v44, 0.0  ;;  %v1656_v19 = vpop.f32.mrb[24].mxu1  ;;  %1853 = vmatpush3.bf16.msra.mxu0 %v2116_v49 }
 0x1e2   :  { %v851_v22 = vadd.f32 %v1656_v19, %v2135_v53  ;;  %v845_v23 = vpop.f32.mrb[25].mxu1  ;;  %1855 = vmatprep.subr.bf16.mxu0 %v2126_v52 }
 0x1e3   :  { %v846_v46 = vadd.f32 %v2135_v53, %v845_v23  ;;  %1707 = vmatprep.mubr.f32.mxu0 %v890_v18 }
 0x1e4   :  { %1708 = vmatmul.mubr.f32.gmra.mrb[38].mxu0 %v891_v20  ;;  %v893_v27 = vmax.f32 %v851_v22, 0.0 }
 0x1e5   :  { %v892_v24 = vmax.f32 %v846_v46, 0.0  ;;  %v1659_v25 = vpop.f32.mrb[26].mxu1  ;;  %1857 = vmatpush3.bf16.msra.mxu0 %v2126_v52 }
 0x1e6   :  { %v861_v10 = vadd.f32 %v1659_v25, %v2135_v53  ;;  %v855_v28 = vpop.f32.mrb[27].mxu1 }
 0x1e7   :  { %v856_v49 = vadd.f32 %v2135_v53, %v855_v28  ;;  %1710 = vmatprep.mubr.f32.mxu0 %v892_v24 }
 0x1e8   :  { %1711 = vmatmul.mubr.f32.gmra.mrb[40].mxu0 %v893_v27  ;;  %v895_v32 = vmax.f32 %v861_v10, 0.0 }
 0x1e9   :  { %v894_v29 = vmax.f32 %v856_v49, 0.0  ;;  %v1662_v30 = vpop.f32.mrb[28].mxu1 }
 0x1ea   :  { %v871_v33 = vadd.f32 %v1662_v30, %v2135_v53  ;;  %v865_v11 = vpop.f32.mrb[29].mxu1 }
 0x1eb   :  { %v866_v34 = vadd.f32 %v2135_v53, %v865_v11  ;;  %1713 = vmatprep.mubr.f32.mxu0 %v894_v29 }
 0x1ec   :  { %1714 = vmatmul.mubr.f32.gmra.mrb[42].mxu0 %v895_v32  ;;  %v897_v37 = vmax.f32 %v871_v33, 0.0 }
 0x1ed   :  { %v896_v35 = vmax.f32 %v866_v34, 0.0  ;;  %v1665_v52 = vpop.f32.mrb[30].mxu1 }
 0x1ee   :  { %v881_v38 = vadd.f32 %v1665_v52, %v2135_v53  ;;  %v875_v39 = vpop.f32.mrb[31].mxu1 }
 0x1ef   :  { %v876_v16 = vadd.f32 %v2135_v53, %v875_v39  ;;  %1716 = vmatprep.mubr.f32.mxu0 %v896_v35 }
 0x1f0   :  { %1717 = vmatmul.mubr.f32.gmra.mrb[44].mxu0 %v897_v37  ;;  %v899_v42 = vmax.f32 %v881_v38, 0.0 }
 0x1f1   :  { %v898_v41 = vmax.f32 %v876_v16, 0.0 }
 0x1f3   :  { %1719 = vmatprep.mubr.f32.mxu0 %v898_v41 }
 0x1f4   :  { %1720 = vmatmul.mubr.f32.gmra.mrb[46].mxu0 %v899_v42 }
 0x28b   :  { %v1618_v45 = vpop.f32.mrb[16].mxu0 }
 0x28c   :  { %v585_v47 = vadd.f32 %v1618_v45, %v2306_v43  ;;  %v579_v21 = vpop.f32.mrb[17].mxu0 }
 0x28d   :  { %v580_v48 = vadd.f32 %v2306_v43, %v579_v21 }
 0x28e   :  { %659 = vst [vmem:[#allocation2 + $0x8] sm:$0xff] %v585_v47 }
 0x28f   :  { %658 = vst [vmem:[#allocation2] sm:$0xff] %v580_v48  ;;  %v1621_v53 = vpop.f32.mrb[18].mxu0 }
 0x290   :  { %v595_v50 = vadd.f32 %v1621_v53, %v2306_v43  ;;  %v589_v51 = vpop.f32.mrb[19].mxu0 }
 0x291   :  { %v590_v54 = vadd.f32 %v2306_v43, %v589_v51 }
 0x292   :  { %661 = vst [vmem:[#allocation2 + $0x18] sm:$0xff] %v595_v50 }
 0x293   :  { %660 = vst [vmem:[#allocation2 + $0x10] sm:$0xff] %v590_v54  ;;  %v1624_v55 = vpop.f32.mrb[20].mxu0 }
 0x294   :  { %v605_v26 = vadd.f32 %v1624_v55, %v2306_v43  ;;  %v599_v56 = vpop.f32.mrb[21].mxu0 }
 0x295   :  { %v600_v57 = vadd.f32 %v2306_v43, %v599_v56 }
 0x296   :  { %663 = vst [vmem:[#allocation2 + $0x28] sm:$0xff] %v605_v26 }
 0x297   :  { %662 = vst [vmem:[#allocation2 + $0x20] sm:$0xff] %v600_v57  ;;  %v1627_v58 = vpop.f32.mrb[22].mxu0 }
 0x298   :  { %v615_v59 = vadd.f32 %v1627_v58, %v2306_v43  ;;  %v609_v60 = vpop.f32.mrb[23].mxu0 }
 0x299   :  { %v610_v31 = vadd.f32 %v2306_v43, %v609_v60 }
 0x29a   :  { %665 = vst [vmem:[#allocation2 + $0x38] sm:$0xff] %v615_v59 }
 0x29b   :  { %664 = vst [vmem:[#allocation2 + $0x30] sm:$0xff] %v610_v31  ;;  %v1630_v61 = vpop.f32.mrb[24].mxu0 }
 0x29c   :  { %v625_v62 = vadd.f32 %v1630_v61, %v2306_v43  ;;  %v619_v63 = vpop.f32.mrb[25].mxu0 }
 0x29d   :  { %v620_v1 = vadd.f32 %v2306_v43, %v619_v63 }
 0x29e   :  { %667 = vst [vmem:[#allocation2 + $0x48] sm:$0xff] %v625_v62 }
 0x29f   :  { %666 = vst [vmem:[#allocation2 + $0x40] sm:$0xff] %v620_v1  ;;  %v1633_v2 = vpop.f32.mrb[26].mxu0 }
 0x2a0   :  { %v635_v36 = vadd.f32 %v1633_v2, %v2306_v43  ;;  %v629_v3 = vpop.f32.mrb[27].mxu0 }
 0x2a1   :  { %v630_v5 = vadd.f32 %v2306_v43, %v629_v3 }
 0x2a2   :  { %669 = vst [vmem:[#allocation2 + $0x58] sm:$0xff] %v635_v36 }
 0x2a3   :  { %668 = vst [vmem:[#allocation2 + $0x50] sm:$0xff] %v630_v5  ;;  %v1636_v6 = vpop.f32.mrb[28].mxu0 }
 0x2a4   :  { %v645_v7 = vadd.f32 %v1636_v6, %v2306_v43  ;;  %v639_v8 = vpop.f32.mrb[29].mxu0 }
 0x2a5   :  { %v640_v9 = vadd.f32 %v2306_v43, %v639_v8 }
 0x2a6   :  { %671 = vst [vmem:[#allocation2 + $0x68] sm:$0xff] %v645_v7 }
 0x2a7   :  { %670 = vst [vmem:[#allocation2 + $0x60] sm:$0xff] %v640_v9  ;;  %v1639_v12 = vpop.f32.mrb[30].mxu0 }
 0x2a8   :  { %v655_v40 = vadd.f32 %v1639_v12, %v2306_v43  ;;  %v649_v13 = vpop.f32.mrb[31].mxu0 }
 0x2a9   :  { %v650_v14 = vadd.f32 %v2306_v43, %v649_v13 }
 0x2aa   :  { %673 = vst [vmem:[#allocation2 + $0x78] sm:$0xff] %v655_v40 }
 0x2ab   :  { %672 = vst [vmem:[#allocation2 + $0x70] sm:$0xff] %v650_v14  ;;  %v1700_v0 = vpop.f32.mrb[32].mxu0 }
 0x2ac   :  { %v972_v15 = vadd.f32 %v1700_v0, %v2230_v4  ;;  %v966_v17 = vpop.f32.mrb[33].mxu0 }
 0x2ad   :  { %v967_v44 = vadd.f32 %v2230_v4, %v966_v17 }
 0x2ae   :  { %v1046_v20 = vmax.f32 %v972_v15, 0.0 }
 0x2af   :  { %v1045_v18 = vmax.f32 %v967_v44, 0.0  ;;  %v1703_v19 = vpop.f32.mrb[34].mxu0 }
 0x2b0   :  { %v982_v22 = vadd.f32 %v1703_v19, %v2230_v4  ;;  %v976_v23 = vpop.f32.mrb[35].mxu0 }
 0x2b1   :  { %v977_v46 = vadd.f32 %v2230_v4, %v976_v23  ;;  %1738 = vmatprep.mubr.msk.f32.mxu0 %vm464_vm2, %v1045_v18 }
 0x2b2   :  { %1739 = vmatmul.mubr.msk.f32.vlgmr.msra.gmra.mrb[48].mxu0 %vm464_vm2, %v1046_v20  ;;  %v1048_v27 = vmax.f32 %v982_v22, 0.0 }
 0x2b3   :  { %v1047_v24 = vmax.f32 %v977_v46, 0.0  ;;  %v1706_v25 = vpop.f32.mrb[36].mxu0 }
 0x2b4   :  { %v992_v10 = vadd.f32 %v1706_v25, %v2230_v4  ;;  %v986_v28 = vpop.f32.mrb[37].mxu0 }
 0x2b5   :  { %v987_v49 = vadd.f32 %v2230_v4, %v986_v28  ;;  %1741 = vmatprep.mubr.msk.f32.mxu0 %vm464_vm2, %v1047_v24 }
 0x2b6   :  { %1742 = vmatmul.mubr.msk.f32.gmra.mrb[50].mxu0 %vm464_vm2, %v1048_v27  ;;  %v1050_v32 = vmax.f32 %v992_v10, 0.0 }
 0x2b7   :  { %v1049_v29 = vmax.f32 %v987_v49, 0.0  ;;  %v1709_v30 = vpop.f32.mrb[38].mxu0 }
 0x2b8   :  { %v1002_v33 = vadd.f32 %v1709_v30, %v2230_v4  ;;  %v996_v11 = vpop.f32.mrb[39].mxu0 }
 0x2b9   :  { %v997_v34 = vadd.f32 %v2230_v4, %v996_v11  ;;  %1744 = vmatprep.mubr.msk.f32.mxu0 %vm464_vm2, %v1049_v29 }
 0x2ba   :  { %1745 = vmatmul.mubr.msk.f32.gmra.mrb[52].mxu0 %vm464_vm2, %v1050_v32  ;;  %v1052_v37 = vmax.f32 %v1002_v33, 0.0 }
 0x2bb   :  { %v1051_v35 = vmax.f32 %v997_v34, 0.0  ;;  %v1712_v52 = vpop.f32.mrb[40].mxu0 }
 0x2bc   :  { %v1012_v38 = vadd.f32 %v1712_v52, %v2230_v4  ;;  %v1006_v39 = vpop.f32.mrb[41].mxu0 }
 0x2bd   :  { %v1007_v16 = vadd.f32 %v2230_v4, %v1006_v39  ;;  %1747 = vmatprep.mubr.msk.f32.mxu1 %vm464_vm2, %v1051_v35 }
 0x2be   :  { %1748 = vmatmul.mubr.msk.f32.vlgmr.msra.gmra.mrb[32].mxu1 %vm464_vm2, %v1052_v37  ;;  %v1054_v45 = vmax.f32 %v1012_v38, 0.0 }
 0x2bf   :  { %v1053_v41 = vmax.f32 %v1007_v16, 0.0  ;;  %v1715_v42 = vpop.f32.mrb[42].mxu0 }
 0x2c0   :  { %v1022_v47 = vadd.f32 %v1715_v42, %v2230_v4  ;;  %v1016_v21 = vpop.f32.mrb[43].mxu0 }
 0x2c1   :  { %v1017_v48 = vadd.f32 %v2230_v4, %v1016_v21  ;;  %1750 = vmatprep.mubr.msk.f32.mxu1 %vm464_vm2, %v1053_v41 }
 0x2c2   :  { %1751 = vmatmul.mubr.msk.f32.gmra.mrb[34].mxu1 %vm464_vm2, %v1054_v45  ;;  %v1056_v51 = vmax.f32 %v1022_v47, 0.0 }
 0x2c3   :  { %v1055_v53 = vmax.f32 %v1017_v48, 0.0  ;;  %v1718_v50 = vpop.f32.mrb[44].mxu0 }
 0x2c4   :  { %v1032_v54 = vadd.f32 %v1718_v50, %v2230_v4  ;;  %v1026_v55 = vpop.f32.mrb[45].mxu0 }
 0x2c5   :  { %v1027_v26 = vadd.f32 %v2230_v4, %v1026_v55  ;;  %1753 = vmatprep.mubr.msk.f32.mxu1 %vm464_vm2, %v1055_v53 }
 0x2c6   :  { %1754 = vmatmul.mubr.msk.f32.gmra.mrb[36].mxu1 %vm464_vm2, %v1056_v51  ;;  %v1058_v58 = vmax.f32 %v1032_v54, 0.0 }
 0x2c7   :  { %v1057_v56 = vmax.f32 %v1027_v26, 0.0  ;;  %v1721_v57 = vpop.f32.mrb[46].mxu0 }
 0x2c8   :  { %v1042_v59 = vadd.f32 %v1721_v57, %v2230_v4  ;;  %v1036_v60 = vpop.f32.mrb[47].mxu0 }
 0x2c9   :  { %v1037_v31 = vadd.f32 %v2230_v4, %v1036_v60  ;;  %1756 = vmatprep.mubr.msk.f32.mxu1 %vm464_vm2, %v1057_v56 }
 0x2ca   :  { %1757 = vmatmul.mubr.msk.f32.gmra.mrb[38].mxu1 %vm464_vm2, %v1058_v58  ;;  %v1060_v62 = vmax.f32 %v1042_v59, 0.0 }
 0x2cb   :  { %v1059_v61 = vmax.f32 %v1037_v31, 0.0 }
 0x2cd   :  { %1759 = vmatprep.mubr.msk.f32.mxu1 %vm464_vm2, %v1059_v61 }
 0x2ce   :  { %1760 = vmatmul.mubr.msk.f32.gmra.mrb[40].mxu1 %vm464_vm2, %v1060_v62 }
 0x385   :  { %v1740_v63 = vpop.f32.mrb[48].mxu0 }
 0x386   :  { %v1181_v1 = vadd.f32 %v1740_v63, %v2306_v43  ;;  %v1175_v2 = vpop.f32.mrb[49].mxu0 }
 0x387   :  { %v1176_v36 = vadd.f32 %v2306_v43, %v1175_v2 }
 0x388   :  { %1256 = vst [vmem:[#allocation2 + $0x88] sm:$0xff] %v1181_v1 }
 0x389   :  { %1255 = vst [vmem:[#allocation2 + $0x80] sm:$0xff] %v1176_v36  ;;  %v1743_v3 = vpop.f32.mrb[50].mxu0 }
 0x38a   :  { %v1191_v4 = vadd.f32 %v1743_v3, %v2306_v43  ;;  %v1185_v5 = vpop.f32.mrb[51].mxu0 }
 0x38b   :  { %v1186_v6 = vadd.f32 %v2306_v43, %v1185_v5 }
 0x38c   :  { %1258 = vst [vmem:[#allocation2 + $0x98] sm:$0xff] %v1191_v4 }
 0x38d   :  { %1257 = vst [vmem:[#allocation2 + $0x90] sm:$0xff] %v1186_v6  ;;  %v1746_v7 = vpop.f32.mrb[52].mxu0 }
 0x38e   :  { %v1201_v8 = vadd.f32 %v1746_v7, %v2306_v43  ;;  %v1195_v9 = vpop.f32.mrb[53].mxu0 }
 0x38f   :  { %v1196_v12 = vadd.f32 %v2306_v43, %v1195_v9 }
 0x390   :  { %1260 = vst [vmem:[#allocation2 + $0xa8] sm:$0xff] %v1201_v8 }
 0x391   :  { %1259 = vst [vmem:[#allocation2 + $0xa0] sm:$0xff] %v1196_v12  ;;  %v1749_v40 = vpop.f32.mrb[32].mxu1 }
 0x392   :  { %v1211_v13 = vadd.f32 %v1749_v40, %v2306_v43  ;;  %v1205_v14 = vpop.f32.mrb[33].mxu1 }
 0x393   :  { %v1206_v0 = vadd.f32 %v2306_v43, %v1205_v14 }
 0x394   :  { %1262 = vst [vmem:[#allocation2 + $0xb8] sm:$0xff] %v1211_v13 }
 0x395   :  { %1261 = vst [vmem:[#allocation2 + $0xb0] sm:$0xff] %v1206_v0  ;;  %v1752_v15 = vpop.f32.mrb[34].mxu1 }
 0x396   :  { %v1221_v17 = vadd.f32 %v1752_v15, %v2306_v43  ;;  %v1215_v44 = vpop.f32.mrb[35].mxu1 }
 0x397   :  { %v1216_v18 = vadd.f32 %v2306_v43, %v1215_v44 }
 0x398   :  { %1264 = vst [vmem:[#allocation2 + $0xc8] sm:$0xff] %v1221_v17 }
 0x399   :  { %1263 = vst [vmem:[#allocation2 + $0xc0] sm:$0xff] %v1216_v18  ;;  %v1755_v19 = vpop.f32.mrb[36].mxu1 }
 0x39a   :  { %v1231_v20 = vadd.f32 %v1755_v19, %v2306_v43  ;;  %v1225_v22 = vpop.f32.mrb[37].mxu1 }
 0x39b   :  { %v1226_v23 = vadd.f32 %v2306_v43, %v1225_v22 }
 0x39c   :  { %1266 = vst [vmem:[#allocation2 + $0xd8] sm:$0xff] %v1231_v20 }
 0x39d   :  { %1265 = vst [vmem:[#allocation2 + $0xd0] sm:$0xff] %v1226_v23  ;;  %v1758_v46 = vpop.f32.mrb[38].mxu1 }
 0x39e   :  { %v1241_v24 = vadd.f32 %v1758_v46, %v2306_v43  ;;  %v1235_v25 = vpop.f32.mrb[39].mxu1 }
 0x39f   :  { %v1236_v27 = vadd.f32 %v2306_v43, %v1235_v25 }
 0x3a0   :  { %1268 = vst [vmem:[#allocation2 + $0xe8] sm:$0xff] %v1241_v24 }
 0x3a1   :  { %1267 = vst [vmem:[#allocation2 + $0xe0] sm:$0xff] %v1236_v27  ;;  %v1761_v10 = vpop.f32.mrb[40].mxu1 }
 0x3a2   :  { %v1251_v28 = vadd.f32 %v1761_v10, %v2306_v43  ;;  %v1245_v49 = vpop.f32.mrb[41].mxu1 }
 0x3a3   :  { %v1246_v29 = vadd.f32 %v2306_v43, %v1245_v49 }
 0x3a4   :  { %1270 = vst [vmem:[#allocation2 + $0xf8] sm:$0xff] %v1251_v28 }
 0x3a5   :  { %1269 = vst [vmem:[#allocation2 + $0xf0] sm:$0xff] %v1246_v29 }
 0x3a6   :  { %1880 = shalt.err (!%p1877_p4)
}
 0x3a7   :  { %s1881_s20 = scalar_lea.hbm %s2391_s7, 4096 }
 0x3a8   :  { %p1882_p5 = scmp.ne.s32.totalorder %s2391_s7, %s1881_s20  ;;  %p1885_p6 = scmp.lt.u32.totalorder %s1881_s20, %s2391_s7 }
 0x3aa   :  { %p1887_p7 = pnand %p1885_p6, %p1882_p5 }
 0x3ac   :  { %1890 = shalt.err (!%p1887_p7)
}
 0x3ad   :  { %s1894_s24 = smov 128   ;;  %s1895_s25 = smov 8  }
 0x3ae   :  { %1282 = dma.vmem_to_hbm [thread:$0]  %s1277_s16, 4096, %s2391_s7, [#allocation3], %s1894_s24, %s1894_s24, %s1895_s25  }
 0x3af   :  { %1891 = dma.done.wait [#allocation3], 4096  }
 0x3b0   :  { %1892 = vsyncadd [#allocation3], 4294963200 }
 0x3b1   :  { %1286 = vsyncpa [#allocation3], 1 }

</bundles_post_ra>
